<compile_context>
chip_gen: v5e
topology: v5e:2x2
jax: 0.10.0
libtpu: 0.0.40
codegen_flags: <defaults>
</compile_context>

<pallas_src>
import functools

import jax
import jax.numpy as jnp
from jax import lax
from jax.experimental import pallas as pl
from jax.experimental.pallas import tpu as pltpu


def _round_up(x, m):
    return (x + m - 1) // m * m


def _sublane(dtype):
    # Rows per packed vreg sublane group: 8 for 32-bit, 16 for bf16, 32 for int8.
    return max(8, 32 // jnp.dtype(dtype).itemsize)


def _self_output_kernel(x_ref, res_ref, w_ref, b_ref, g_ref, beta_ref, o_ref,
                        *, eps: float):
    # x_ref:    (TM, H) attention-output tile (native dtype -> MXU directly)
    # res_ref:  (TM, H) residual (input_tensor) tile
    # w_ref:    (H, H)  dense weight already in (in, out) layout -> x @ w
    # b_ref/g_ref/beta_ref: (1, H) bias / LayerNorm gamma / beta (f32)

    # Dense: canonical [M,K]@[K,N] MXU matmul, f32 accumulation.
    h = jnp.dot(x_ref[...], w_ref[...], preferred_element_type=jnp.float32)

    # TODO(synk): dropout is identity at inference; a training-mode mask would
    # use pltpu.prng_seed / pltpu.prng_random_bits here.

    # Fused bias + residual add (f32).
    h = h + (res_ref[...].astype(jnp.float32) + b_ref[...].astype(jnp.float32))

    # LayerNorm over the hidden (lane) axis, f32 math; rsqrt runs on the EUP.
    mean = jnp.mean(h, axis=-1, keepdims=True)
    cent = h - mean
    var = jnp.mean(cent * cent, axis=-1, keepdims=True)
    out = cent * lax.rsqrt(var + eps)
    out = out * g_ref[...].astype(jnp.float32) + beta_ref[...].astype(jnp.float32)

    o_ref[...] = out.astype(o_ref.dtype)


def prepare_self_output_params(weight, bias, gamma, beta, act_dtype):
    """One-time (load-time) parameter prep.

    Transposes the PyTorch (out_features, in_features) dense weight to
    (in, out) and casts it to the activation dtype so no per-forward transpose
    or HBM cast pass is emitted.  Bias / LayerNorm params stay f32 (the kernel
    does LN math in f32 regardless of activation dtype).
    """
    H = weight.shape[0]
    w_kn = jnp.asarray(weight).T.astype(act_dtype)
    return (w_kn,
            jnp.asarray(bias, jnp.float32).reshape(1, H),
            jnp.asarray(gamma, jnp.float32).reshape(1, H),
            jnp.asarray(beta, jnp.float32).reshape(1, H))


def _pick_row_tile(rows, dtype):
    sub = _sublane(dtype)
    itemsize = jnp.dtype(dtype).itemsize
    # Large streaming tiles amortize the ~0.35us/step pipeline overhead and
    # keep DMA granules big; VMEM demand is re-checked against the
    # per-generation cap in _build_call.
    target = 1024 if itemsize <= 2 else 512
    if rows > target:
        return target
    # Small/medium inputs: split into (at least) two sublane-aligned tiles so
    # the "parallel" row axis can shard across v7x's two TensorCores.
    tile = _round_up(pl.cdiv(rows, 2), sub)
    return max(sub, min(tile, _round_up(rows, sub)))


def _vmem_cap_bytes():
    # ~70% of per-core VMEM (v7x: 64 MiB -> ~44 MiB; v5e/v6e: 128 MiB -> ~89 MiB),
    # leaving headroom for compiler-internal scratch and semaphores.
    try:
        phys = pltpu.get_tpu_info().vmem_capacity_bytes
    except Exception:
        phys = 64 * 1024 * 1024          # conservative (v7x-sized) fallback
    return int(min(phys * 0.7, 96 * 1024 * 1024))


def _build_call(rows, H, act_dtype, w_dtype, *, row_tile, eps, buffered_consts):
    grid = (pl.cdiv(rows, row_tile),)
    const_kw = {"pipeline_mode": pl.Buffered(1)} if buffered_consts else {}

    itemsize = jnp.dtype(act_dtype).itemsize
    w_bytes = H * H * jnp.dtype(w_dtype).itemsize
    tile_bytes = row_tile * H * itemsize
    w_bufs = 1 if buffered_consts else 2
    need = (w_bufs * w_bytes                # resident weight
            + 3 * 2 * tile_bytes            # x / res / out tiles, double-buffered
            + 3 * row_tile * H * 4          # f32 LayerNorm temporaries
            + 2 * 3 * H * 4)                # bias / gamma / beta
    vmem_limit = int(min(max(int(1.5 * need), 16 * 1024 * 1024),
                         _vmem_cap_bytes()))

    cost = pl.CostEstimate(
        flops=2 * rows * H * H + 10 * rows * H,
        transcendentals=rows,               # one rsqrt per row
        bytes_accessed=3 * rows * H * itemsize + w_bytes + 3 * H * 4)

    return pl.pallas_call(
        functools.partial(_self_output_kernel, eps=eps),
        out_shape=jax.ShapeDtypeStruct((rows, H), act_dtype),
        grid_spec=pltpu.PrefetchScalarGridSpec(
            num_scalar_prefetch=0,
            grid=grid,
            in_specs=[
                pl.BlockSpec((row_tile, H), lambda i: (i, 0)),        # x tile
                pl.BlockSpec((row_tile, H), lambda i: (i, 0)),        # residual
                pl.BlockSpec((H, H), lambda i: (0, 0), **const_kw),   # weight
                pl.BlockSpec((1, H), lambda i: (0, 0), **const_kw),   # bias
                pl.BlockSpec((1, H), lambda i: (0, 0), **const_kw),   # gamma
                pl.BlockSpec((1, H), lambda i: (0, 0), **const_kw),   # beta
            ],
            out_specs=pl.BlockSpec((row_tile, H), lambda i: (i, 0)),
        ),
        compiler_params=pltpu.CompilerParams(
            dimension_semantics=("parallel",),
            vmem_limit_bytes=vmem_limit),
        cost_estimate=cost,
    )


_CONST_SINGLE_BUFFER_OK = None   # cache: does this jax accept pl.Buffered(1)?


def bert_self_output(hidden_states, input_tensor, w_kn, bias2, gamma2, beta2,
                     *, eps=1e-12, row_tile=None):
    """hidden_states, input_tensor: [B, S, H].  Remaining args come from
    prepare_self_output_params (weight already transposed to (in, out))."""
    global _CONST_SINGLE_BUFFER_OK
    B, S, H = hidden_states.shape
    rows = B * S
    act_dtype = hidden_states.dtype

    if row_tile is None:
        row_tile = _pick_row_tile(rows, act_dtype)
    sub = _sublane(act_dtype)
    row_tile = max(sub, _round_up(int(row_tile), sub))

    # Collapsing leading dims of a contiguous array is metadata-only (no copy).
    x2 = hidden_states.reshape(rows, H)
    r2 = input_tensor.reshape(rows, H)
    args = (x2, r2, w_kn, bias2, gamma2, beta2)

    if _CONST_SINGLE_BUFFER_OK is None:
        try:
            out = _build_call(rows, H, act_dtype, w_kn.dtype, row_tile=row_tile,
                              eps=eps, buffered_consts=True)(*args)
            _CONST_SINGLE_BUFFER_OK = True
        except Exception:
            # Older jax without BlockSpec pipeline_mode: fall back to default
            # (double-buffered) grid-invariant blocks.
            _CONST_SINGLE_BUFFER_OK = False
            out = _build_call(rows, H, act_dtype, w_kn.dtype, row_tile=row_tile,
                              eps=eps, buffered_consts=False)(*args)
    else:
        out = _build_call(rows, H, act_dtype, w_kn.dtype, row_tile=row_tile,
                          eps=eps,
                          buffered_consts=_CONST_SINGLE_BUFFER_OK)(*args)

    return out.reshape(B, S, H)


def _reference(hidden_states, input_tensor, weight, bias, gamma, beta, eps=1e-12):
    h = jnp.einsum("bsh,oh->bso", hidden_states.astype(jnp.float32),
                   weight.astype(jnp.float32)) + bias
    h = h + input_tensor.astype(jnp.float32)
    mean = jnp.mean(h, axis=-1, keepdims=True)
    var = jnp.mean((h - mean) ** 2, axis=-1, keepdims=True)
    return (h - mean) / jnp.sqrt(var + eps) * gamma + beta


if __name__ == "__main__":
    H = 32
    key = jax.random.PRNGKey(0)
    k1, k2, k3, k4, k5, k6 = jax.random.split(key, 6)

    # Deterministic parameters (nn.Linear-like uniform, LayerNorm gamma=1, beta=0).
    bound = 1.0 / (H ** 0.5)
    weight = jax.random.uniform(k3, (H, H), minval=-bound, maxval=bound,
                                dtype=jnp.float32)   # PyTorch (out, in) layout
    bias = jax.random.uniform(k4, (H,), minval=-bound, maxval=bound,
                              dtype=jnp.float32)
    gamma = jnp.ones((H,), dtype=jnp.float32)
    beta = jnp.zeros((H,), dtype=jnp.float32)

    # One-time (load-time) parameter prep: transpose + cast hoisted out of the
    # per-forward path.
    params_f32 = prepare_self_output_params(weight, bias, gamma, beta, jnp.float32)

    # Case 1: B=2, S=8 -> rows=16, auto 8-row tile -> 2-step "parallel" grid
    # (megacore-shardable on v7x).
    B, S = 2, 8
    hs1 = jax.random.normal(k1, (B, S, H), dtype=jnp.float32)
    res1 = jax.random.normal(k2, (B, S, H), dtype=jnp.float32)
    out1 = jax.block_until_ready(bert_self_output(hs1, res1, *params_f32))
    ref1 = _reference(hs1, res1, weight, bias, gamma, beta)
    assert jnp.allclose(out1, ref1, atol=1e-4, rtol=1e-4), "mismatch (case 1)"

    # Case 2: rows=15 is not a multiple of the 8-row tile -> ragged last block
    # handled by Pallas masking (no host-side pad / slice HBM passes).
    B2, S2 = 3, 5
    hs2 = jax.random.normal(k5, (B2, S2, H), dtype=jnp.float32)
    res2 = jax.random.normal(k6, (B2, S2, H), dtype=jnp.float32)
    out2 = jax.block_until_ready(
        bert_self_output(hs2, res2, *params_f32, row_tile=8))
    ref2 = _reference(hs2, res2, weight, bias, gamma, beta)
    assert jnp.allclose(out2, ref2, atol=1e-4, rtol=1e-4), "mismatch (case 2)"

    # Case 3: bf16 streaming activations + bf16 MXU operands (f32 accumulate,
    # f32 LayerNorm) — the main HBM-bandwidth lever when precision allows.
    params_bf16 = prepare_self_output_params(weight, bias, gamma, beta, jnp.bfloat16)
    hs3 = hs1.astype(jnp.bfloat16)
    res3 = res1.astype(jnp.bfloat16)
    out3 = jax.block_until_ready(bert_self_output(hs3, res3, *params_bf16))
    assert jnp.allclose(out3.astype(jnp.float32), ref1, atol=1e-1, rtol=1e-1), \
        "mismatch (case 3, bf16)"

    print("KERNEL_OK")
</pallas_src>

<mosaic_0001>
module attributes {stable_mosaic.version = 11 : i64} {
  func.func @_self_output_kernel(%arg0: i32, %arg1: memref<8x32xf32, #tpu.memory_space<vmem>>, %arg2: memref<8x32xf32, #tpu.memory_space<vmem>>, %arg3: memref<32x32xf32, #tpu.memory_space<vmem>>, %arg4: memref<1x32xf32, #tpu.memory_space<vmem>>, %arg5: memref<1x32xf32, #tpu.memory_space<vmem>>, %arg6: memref<1x32xf32, #tpu.memory_space<vmem>>, %arg7: memref<8x32xf32, #tpu.memory_space<vmem>>) attributes {dimension_semantics = [#tpu.dimension_semantics<parallel>], iteration_bounds = array<i64: 2>, scalar_prefetch = 0 : i64, scratch_operands = 0 : i64, tpu.core_type = #tpu.core_type<tc>, window_params = [{transform_indices = @transform_0, window_bounds = array<i64: 8, 32>}, {transform_indices = @transform_1, window_bounds = array<i64: 8, 32>}, {pipeline_mode = #tpu.pipeline_mode<synchronous>, transform_indices = @transform_2, window_bounds = array<i64: 32, 32>}, {pipeline_mode = #tpu.pipeline_mode<synchronous>, transform_indices = @transform_3, window_bounds = array<i64: 1, 32>}, {pipeline_mode = #tpu.pipeline_mode<synchronous>, transform_indices = @transform_4, window_bounds = array<i64: 1, 32>}, {pipeline_mode = #tpu.pipeline_mode<synchronous>, transform_indices = @transform_5, window_bounds = array<i64: 1, 32>}, {transform_indices = @transform_6, window_bounds = array<i64: 8, 32>}]} {
    %c0 = arith.constant 0 : index
    %c0_0 = arith.constant 0 : index
    %0 = vector.load %arg1[%c0, %c0_0] : memref<8x32xf32, #tpu.memory_space<vmem>>, vector<8x32xf32>
    %c0_1 = arith.constant 0 : index
    %c0_2 = arith.constant 0 : index
    %1 = vector.load %arg3[%c0_1, %c0_2] : memref<32x32xf32, #tpu.memory_space<vmem>>, vector<32x32xf32>
    %cst = arith.constant dense<0.000000e+00> : vector<8x32xf32>
    %2 = tpu.matmul %0, %1, %cst {dimension_numbers = #tpu.dot_dimension_numbers<[1], [0], [0], [1], [0, 0, 1, 1], [], []>} : vector<8x32xf32>, vector<32x32xf32>, vector<8x32xf32> -> vector<8x32xf32>
    %c0_3 = arith.constant 0 : index
    %c0_4 = arith.constant 0 : index
    %3 = vector.load %arg2[%c0_3, %c0_4] : memref<8x32xf32, #tpu.memory_space<vmem>>, vector<8x32xf32>
    %c0_5 = arith.constant 0 : index
    %c0_6 = arith.constant 0 : index
    %4 = vector.load %arg4[%c0_5, %c0_6] : memref<1x32xf32, #tpu.memory_space<vmem>>, vector<1x32xf32>
    %5 = vector.broadcast %4 : vector<1x32xf32> to vector<8x32xf32>
    %6 = arith.addf %3, %5 : vector<8x32xf32>
    %7 = arith.addf %2, %6 : vector<8x32xf32>
    %cst_7 = arith.constant dense<0.000000e+00> : vector<8xf32>
    %8 = vector.multi_reduction <add>, %7, %cst_7 [1] : vector<8x32xf32> to vector<8xf32>
    %9 = vector.shape_cast %8 : vector<8xf32> to vector<8x1xf32>
    %cst_8 = arith.constant 3.200000e+01 : f32
    %10 = vector.broadcast %cst_8 : f32 to vector<8x1xf32>
    %11 = arith.divf %9, %10 : vector<8x1xf32>
    %12 = vector.broadcast %11 : vector<8x1xf32> to vector<8x32xf32>
    %13 = arith.subf %7, %12 : vector<8x32xf32>
    %14 = arith.mulf %13, %13 : vector<8x32xf32>
    %cst_9 = arith.constant dense<0.000000e+00> : vector<8xf32>
    %15 = vector.multi_reduction <add>, %14, %cst_9 [1] : vector<8x32xf32> to vector<8xf32>
    %16 = vector.shape_cast %15 : vector<8xf32> to vector<8x1xf32>
    %cst_10 = arith.constant 3.200000e+01 : f32
    %17 = vector.broadcast %cst_10 : f32 to vector<8x1xf32>
    %18 = arith.divf %16, %17 : vector<8x1xf32>
    %cst_11 = arith.constant 9.99999996E-13 : f32
    %19 = vector.broadcast %cst_11 : f32 to vector<8x1xf32>
    %20 = arith.addf %18, %19 : vector<8x1xf32>
    %21 = math.rsqrt %20 : vector<8x1xf32>
    %22 = vector.broadcast %21 : vector<8x1xf32> to vector<8x32xf32>
    %23 = arith.mulf %13, %22 : vector<8x32xf32>
    %c0_12 = arith.constant 0 : index
    %c0_13 = arith.constant 0 : index
    %24 = vector.load %arg5[%c0_12, %c0_13] : memref<1x32xf32, #tpu.memory_space<vmem>>, vector<1x32xf32>
    %25 = vector.broadcast %24 : vector<1x32xf32> to vector<8x32xf32>
    %26 = arith.mulf %23, %25 : vector<8x32xf32>
    %c0_14 = arith.constant 0 : index
    %c0_15 = arith.constant 0 : index
    %27 = vector.load %arg6[%c0_14, %c0_15] : memref<1x32xf32, #tpu.memory_space<vmem>>, vector<1x32xf32>
    %28 = vector.broadcast %27 : vector<1x32xf32> to vector<8x32xf32>
    %29 = arith.addf %26, %28 : vector<8x32xf32>
    %c0_16 = arith.constant 0 : index
    %c0_17 = arith.constant 0 : index
    %30 = vector.load %arg7[%c0_16, %c0_17] : memref<8x32xf32, #tpu.memory_space<vmem>>, vector<8x32xf32>
    tpu.vector_store %arg7[%c0_16, %c0_17], %29 {strides = array<i32>} : memref<8x32xf32, #tpu.memory_space<vmem>>, vector<8x32xf32>,
    return
  }
  func.func @transform_0(%arg0: i32) -> (i32, i32) {
    %c0_i32 = arith.constant 0 : i32
    %c0_i32_0 = arith.constant 0 : i32
    return %arg0, %c0_i32 : i32, i32
  }
  func.func @transform_1(%arg0: i32) -> (i32, i32) {
    %c0_i32 = arith.constant 0 : i32
    %c0_i32_0 = arith.constant 0 : i32
    return %arg0, %c0_i32 : i32, i32
  }
  func.func @transform_2(%arg0: i32) -> (i32, i32) {
    %c0_i32 = arith.constant 0 : i32
    %c0_i32_0 = arith.constant 0 : i32
    %c0_i32_1 = arith.constant 0 : i32
    return %c0_i32, %c0_i32_0 : i32, i32
  }
  func.func @transform_3(%arg0: i32) -> (i32, i32) {
    %c0_i32 = arith.constant 0 : i32
    %c0_i32_0 = arith.constant 0 : i32
    %c0_i32_1 = arith.constant 0 : i32
    return %c0_i32, %c0_i32_0 : i32, i32
  }
  func.func @transform_4(%arg0: i32) -> (i32, i32) {
    %c0_i32 = arith.constant 0 : i32
    %c0_i32_0 = arith.constant 0 : i32
    %c0_i32_1 = arith.constant 0 : i32
    return %c0_i32, %c0_i32_0 : i32, i32
  }
  func.func @transform_5(%arg0: i32) -> (i32, i32) {
    %c0_i32 = arith.constant 0 : i32
    %c0_i32_0 = arith.constant 0 : i32
    %c0_i32_1 = arith.constant 0 : i32
    return %c0_i32, %c0_i32_0 : i32, i32
  }
  func.func @transform_6(%arg0: i32) -> (i32, i32) {
    %c0_i32 = arith.constant 0 : i32
    %c0_i32_0 = arith.constant 0 : i32
    return %arg0, %c0_i32 : i32, i32
  }
}

module attributes {stable_mosaic.version = 11 : i64} {
  func.func @_self_output_kernel(%arg0: i32, %arg1: memref<8x32xf32, #tpu.memory_space<vmem>>, %arg2: memref<8x32xf32, #tpu.memory_space<vmem>>, %arg3: memref<32x32xf32, #tpu.memory_space<vmem>>, %arg4: memref<1x32xf32, #tpu.memory_space<vmem>>, %arg5: memref<1x32xf32, #tpu.memory_space<vmem>>, %arg6: memref<1x32xf32, #tpu.memory_space<vmem>>, %arg7: memref<8x32xf32, #tpu.memory_space<vmem>>) attributes {dimension_semantics = [#tpu.dimension_semantics<parallel>], iteration_bounds = array<i64: 2>, scalar_prefetch = 0 : i64, scratch_operands = 0 : i64, tpu.core_type = #tpu.core_type<tc>, window_params = [{transform_indices = @transform_0, window_bounds = array<i64: 8, 32>}, {transform_indices = @transform_1, window_bounds = array<i64: 8, 32>}, {pipeline_mode = #tpu.pipeline_mode<synchronous>, transform_indices = @transform_2, window_bounds = array<i64: 32, 32>}, {pipeline_mode = #tpu.pipeline_mode<synchronous>, transform_indices = @transform_3, window_bounds = array<i64: 1, 32>}, {pipeline_mode = #tpu.pipeline_mode<synchronous>, transform_indices = @transform_4, window_bounds = array<i64: 1, 32>}, {pipeline_mode = #tpu.pipeline_mode<synchronous>, transform_indices = @transform_5, window_bounds = array<i64: 1, 32>}, {transform_indices = @transform_6, window_bounds = array<i64: 8, 32>}]} {
    %c0 = arith.constant 0 : index
    %c0_0 = arith.constant 0 : index
    %0 = vector.load %arg1[%c0, %c0_0] : memref<8x32xf32, #tpu.memory_space<vmem>>, vector<8x32xf32>
    %c0_1 = arith.constant 0 : index
    %c0_2 = arith.constant 0 : index
    %1 = vector.load %arg3[%c0_1, %c0_2] : memref<32x32xf32, #tpu.memory_space<vmem>>, vector<32x32xf32>
    %cst = arith.constant dense<0.000000e+00> : vector<8x32xf32>
    %2 = tpu.matmul %0, %1, %cst {dimension_numbers = #tpu.dot_dimension_numbers<[1], [0], [0], [1], [0, 0, 1, 1], [], []>} : vector<8x32xf32>, vector<32x32xf32>, vector<8x32xf32> -> vector<8x32xf32>
    %c0_3 = arith.constant 0 : index
    %c0_4 = arith.constant 0 : index
    %3 = vector.load %arg2[%c0_3, %c0_4] : memref<8x32xf32, #tpu.memory_space<vmem>>, vector<8x32xf32>
    %c0_5 = arith.constant 0 : index
    %c0_6 = arith.constant 0 : index
    %4 = vector.load %arg4[%c0_5, %c0_6] : memref<1x32xf32, #tpu.memory_space<vmem>>, vector<1x32xf32>
    %5 = vector.broadcast %4 : vector<1x32xf32> to vector<8x32xf32>
    %6 = arith.addf %3, %5 : vector<8x32xf32>
    %7 = arith.addf %2, %6 : vector<8x32xf32>
    %cst_7 = arith.constant dense<0.000000e+00> : vector<8xf32>
    %8 = vector.multi_reduction <add>, %7, %cst_7 [1] : vector<8x32xf32> to vector<8xf32>
    %9 = vector.shape_cast %8 : vector<8xf32> to vector<8x1xf32>
    %cst_8 = arith.constant 3.200000e+01 : f32
    %10 = vector.broadcast %cst_8 : f32 to vector<8x1xf32>
    %11 = arith.divf %9, %10 : vector<8x1xf32>
    %12 = vector.broadcast %11 : vector<8x1xf32> to vector<8x32xf32>
    %13 = arith.subf %7, %12 : vector<8x32xf32>
    %14 = arith.mulf %13, %13 : vector<8x32xf32>
    %cst_9 = arith.constant dense<0.000000e+00> : vector<8xf32>
    %15 = vector.multi_reduction <add>, %14, %cst_9 [1] : vector<8x32xf32> to vector<8xf32>
    %16 = vector.shape_cast %15 : vector<8xf32> to vector<8x1xf32>
    %cst_10 = arith.constant 3.200000e+01 : f32
    %17 = vector.broadcast %cst_10 : f32 to vector<8x1xf32>
    %18 = arith.divf %16, %17 : vector<8x1xf32>
    %cst_11 = arith.constant 9.99999996E-13 : f32
    %19 = vector.broadcast %cst_11 : f32 to vector<8x1xf32>
    %20 = arith.addf %18, %19 : vector<8x1xf32>
    %21 = math.rsqrt %20 : vector<8x1xf32>
    %22 = vector.broadcast %21 : vector<8x1xf32> to vector<8x32xf32>
    %23 = arith.mulf %13, %22 : vector<8x32xf32>
    %c0_12 = arith.constant 0 : index
    %c0_13 = arith.constant 0 : index
    %24 = vector.load %arg5[%c0_12, %c0_13] : memref<1x32xf32, #tpu.memory_space<vmem>>, vector<1x32xf32>
    %25 = vector.broadcast %24 : vector<1x32xf32> to vector<8x32xf32>
    %26 = arith.mulf %23, %25 : vector<8x32xf32>
    %c0_14 = arith.constant 0 : index
    %c0_15 = arith.constant 0 : index
    %27 = vector.load %arg6[%c0_14, %c0_15] : memref<1x32xf32, #tpu.memory_space<vmem>>, vector<1x32xf32>
    %28 = vector.broadcast %27 : vector<1x32xf32> to vector<8x32xf32>
    %29 = arith.addf %26, %28 : vector<8x32xf32>
    %c0_16 = arith.constant 0 : index
    %c0_17 = arith.constant 0 : index
    %30 = vector.load %arg7[%c0_16, %c0_17] : memref<8x32xf32, #tpu.memory_space<vmem>>, vector<8x32xf32>
    tpu.vector_store %arg7[%c0_16, %c0_17], %29 {strides = array<i32>} : memref<8x32xf32, #tpu.memory_space<vmem>>, vector<8x32xf32>,
    return
  }
  func.func @transform_0(%arg0: i32) -> (i32, i32) {
    %c0_i32 = arith.constant 0 : i32
    %c0_i32_0 = arith.constant 0 : i32
    return %arg0, %c0_i32 : i32, i32
  }
  func.func @transform_1(%arg0: i32) -> (i32, i32) {
    %c0_i32 = arith.constant 0 : i32
    %c0_i32_0 = arith.constant 0 : i32
    return %arg0, %c0_i32 : i32, i32
  }
  func.func @transform_2(%arg0: i32) -> (i32, i32) {
    %c0_i32 = arith.constant 0 : i32
    %c0_i32_0 = arith.constant 0 : i32
    %c0_i32_1 = arith.constant 0 : i32
    return %c0_i32, %c0_i32_0 : i32, i32
  }
  func.func @transform_3(%arg0: i32) -> (i32, i32) {
    %c0_i32 = arith.constant 0 : i32
    %c0_i32_0 = arith.constant 0 : i32
    %c0_i32_1 = arith.constant 0 : i32
    return %c0_i32, %c0_i32_0 : i32, i32
  }
  func.func @transform_4(%arg0: i32) -> (i32, i32) {
    %c0_i32 = arith.constant 0 : i32
    %c0_i32_0 = arith.constant 0 : i32
    %c0_i32_1 = arith.constant 0 : i32
    return %c0_i32, %c0_i32_0 : i32, i32
  }
  func.func @transform_5(%arg0: i32) -> (i32, i32) {
    %c0_i32 = arith.constant 0 : i32
    %c0_i32_0 = arith.constant 0 : i32
    %c0_i32_1 = arith.constant 0 : i32
    return %c0_i32, %c0_i32_0 : i32, i32
  }
  func.func @transform_6(%arg0: i32) -> (i32, i32) {
    %c0_i32 = arith.constant 0 : i32
    %c0_i32_0 = arith.constant 0 : i32
    return %arg0, %c0_i32 : i32, i32
  }
}

</mosaic_0001>

<bundles_post_ra>
// kernel: tpu_custom_call.1
= control target key start
LH: loop header
LB: loop body
LE: loop exit
PB: predicated region body
PF: predicated region fallthrough
CT: control target
= control target key end

     0   :  { %s995_s0 = inlined_call_operand.hbm [shape: f32[16,32], index: 0, kind: input, shape index: {}]   ;;  %s996_s1 = inlined_call_operand.hbm [shape: f32[16,32], index: 1, kind: input, shape index: {}]   ;;  %s997_s2 = inlined_call_operand.hbm [shape: f32[32,32], index: 2, kind: input, shape index: {}]   ;;  %s998_s3 = inlined_call_operand.vmem [shape: f32[1,32], index: 3, kind: input, shape index: {}]   ;;  %s999_s4 = inlined_call_operand.vmem [shape: f32[1,32], index: 4, kind: input, shape index: {}]   ;;  %s1000_s5 = inlined_call_operand.vmem [shape: f32[1,32], index: 5, kind: input, shape index: {}]   ;;  %s1001_s6 = inlined_call_operand.hbm [shape: f32[16,32], index: 6, kind: output, shape index: {}]  }
   0x1   :  { %1006 = sst [smem:[#allocation17_spill]] %s997_s2 }
   0x2   :  { %11 = vsyncpa [#allocation3], 0 }
   0x3   :  { %13 = vsyncpa [#allocation3 + $0x1], 0 }
   0x4   :  { %14 = vsyncpa [#allocation6], 0 }
   0x5   :  { %16 = vsyncpa [#allocation6 + $0x1], 0 }
   0x6   :  { %17 = vsyncpa [#allocation4], 0 }
   0x7   :  { %19 = vsyncpa [#allocation4 + $0x1], 0  ;;  %s812_s21 = smov 0   ;;  %s814_s22 = smov 0  }
   0x8   :  { %s816_s23 = smov 0   ;;  %s818_s24 = smov 0  }
   0x9 LB: > { %1007 = sst [smem:[#allocation13_spill]] %s767_s23  ;;  %s836_s28 = sadd.s32 4294967295, %s771_s24   ;;  %s771_s24 = sphi %s818_s24, %s1020_s24   ;;  %s767_s23 = sphi %s816_s23, %s1022_s23   ;;  %s763_s22 = sphi %s814_s22, %s1024_s22   ;;  %s759_s21 = sphi %s812_s21, %s1023_s21  }
   0xa   : > { %1008 = sst [smem:[#allocation14_spill]] %s771_s24  ;;  %p518_p0 = scmp.ge.s32.totalorder %s771_s24, 1 }
   0xb   : > { %s1009_s2 = sld [smem:[#allocation17_spill]]  ;;  %p46_p1 = scmp.eq.s32.totalorder %s836_s28, 0 }
   0xc   : > { %p192_p2 = scmp.lt.s32.totalorder %s771_s24, 3  ;;  %s773_s30 = smov [#allocation7]  }
   0xd   : > { %s205_s7 = sshll.u32 %s773_s30, 4  ;;  %s774_s8 = smov 128   ;;  %s206_s7 = int_to_ptr.vmem [resolvable:$true] %s205_s7 }
   0xe   : > { %p841_p3 = pnand %p518_p0, %p192_p2  ;;  %s775_s9 = smov 8  }
   0xf   : > { %s517_s10 = sadd.s32 4294967294, %s771_s24   ;;  %s852_s11 = sadd.s32 1, %s771_s24  }
  0x10   : > { %p545_p4 = pneg %p841_p3  ;;  %1011 = sst [smem:[#allocation15_spill]] %s852_s11 }
  0x11   : > { %s203_s27 = sshll.u32 %s1009_s2, 4  ;;  %s32_s12 = sadd.s32 1, %s767_s23  ;;  %s204_s27 = int_to_ptr.hbm [resolvable:$true] %s203_s27 }
  0x12   : > { %p546_p6 = pnand %p545_p4, %p46_p1  ;;  %s29_s13 = ssub.s32 %s771_s24, %s852_s11 }
  0x13   : > { %p39_p7 = scmp.ne.s32.totalorder %s767_s23, %s763_s22  ;;  %p30_p8 = scmp.eq.s32.totalorder %s29_s13, 0 }
  0x14   : > { %548 = dma.hbm_to_vmem [thread:$0]  (!%p546_p6), %s204_s27, 512, %s206_s7, [#allocation6], %s774_s8, %s774_s8, %s775_s9  }
  0x15   : > { %p40_p9 = scmp.eq.s32.totalorder %s771_s24, 0  ;;  %p45_p10 = scmp.ne.s32.totalorder %s763_s22, %s759_s21 }
  0x16   : > { %p179_p11 = scmp.eq.s32.totalorder %s836_s28, 1  ;;  %p185_p2 = scmp.eq.s32.totalorder %s517_s10, 1 }
  0x17   : > { %s864_s14 = scalar_select %p30_p8, %s767_s23, %s32_s12  }
  0x18   : > { %p866_p12 = por %p40_p9, %p39_p7  ;;  %p872_p13 = por %p46_p1, %p45_p10 }
  0x19   : > { %1012 = sst [smem:[#allocation16_spill]] %s864_s14  ;;  %p876_p0 = por %p179_p11, %p39_p7 }
  0x1a   : > { %p561_p4 = scmp.lt.s32.totalorder %s771_s24, 2  ;;  %s228_s18 = sand.u32 1, %s767_s23  }
  0x1b   : > { %p882_p6 = por %p185_p2, %p45_p10  ;;  %s521_s20 = sshll.u32 %s228_s18, 3 }
  0x1c   : > { %s522_s25 = sshll.u32 %s771_s24, 3  ;;  %s232_s8 = scalar_lea.vmem [#allocation2], %s521_s20 }
  0x1d   : > { %s236_s30 = scalar_lea.hbm %s995_s0, %s522_s25  ;;  %s240_s9 = sshll.u32 %s232_s8, 4  ;;  %s241_s9 = int_to_ptr.vmem [resolvable:$true] %s240_s9 }
  0x1e   : > { %s238_s7 = sshll.u32 %s236_s30, 4  ;;  %p892_p7 = pnand %p561_p4, %p866_p12  ;;  %s239_s7 = int_to_ptr.hbm [resolvable:$true] %s238_s7 }
  0x1f   : > { %s255_s2 = scalar_lea.hbm %s996_s1, %s522_s25  ;;  %s247_s14 = sand.u32 1, %s771_s24  }
  0x20   : > { %s229_s23 = scalar_lea.sflag [#allocation3], %s228_s18  ;;  %s637_s26 = sshra.s32 %s239_s7, 4  ;;  %s638_s26 = int_to_ptr.hbm [resolvable:$true] %s637_s26 }
  0x21   : > { %s639_s27 = scalar_lea.hbm %s638_s26, 8  ;;  %p641_p9 = pneg %p892_p7 }
  0x22   : > { %p640_p8 = scmp.ne.s32.totalorder %s638_s26, %s639_s27  ;;  %s644_s8 = scalar_lea.hbm %s995_s0, 16 }
  0x23   : > { %p645_p12 = scmp.lt.s32.totalorder %s638_s26, %s995_s0  ;;  %p646_p2 = scmp.lt.s32.totalorder %s644_s8, %s639_s27 }
  0x24   : > { %p642_p10 = pnand %p641_p9, %p640_p8 }
  0x25   : > { %p647_p4 = por %p646_p2, %p645_p12 }
  0x26   : > { %p643_p11 = pneg %p642_p10 }
  0x28   : > { %p648_p5 = pnand %p647_p4, %p643_p11 }
  0x2a   : > { %651 = shalt.err (!%p648_p5)
}
  0x2b   : > { %552 = dma.hbm_to_vmem [thread:$0]  (!%p892_p7), %s239_s7, 128, %s241_s9, %s229_s23  }
  0x2c   : > { %s257_s18 = sshll.u32 %s255_s2, 4  ;;  %s251_s25 = scalar_lea.vmem [#allocation5], %s521_s20  ;;  %s258_s18 = int_to_ptr.hbm [resolvable:$true] %s257_s18 }
  0x2d   : > { %s259_s11 = sshll.u32 %s251_s25, 4  ;;  %s248_s24 = scalar_lea.sflag [#allocation6], %s247_s14  ;;  %s260_s11 = int_to_ptr.vmem [resolvable:$true] %s259_s11 }
  0x2e   : > { %s667_s15 = sshra.s32 %s258_s18, 4  ;;  %s674_s8 = scalar_lea.hbm %s996_s1, 16  ;;  %s668_s15 = int_to_ptr.hbm [resolvable:$true] %s667_s15 }
  0x2f   : > { %s669_s30 = scalar_lea.hbm %s668_s15, 8  ;;  %p675_p5 = scmp.lt.s32.totalorder %s668_s15, %s996_s1 }
  0x30   : > { %p670_p8 = scmp.ne.s32.totalorder %s668_s15, %s669_s30  ;;  %p676_p11 = scmp.lt.s32.totalorder %s674_s8, %s669_s30 }
  0x32   : > { %p672_p10 = pnand %p670_p8, %p641_p9  ;;  %p677_p2 = por %p676_p11, %p675_p5 }
  0x34   : > { %p673_p12 = pneg %p672_p10 }
  0x36   : > { %p678_p4 = pnand %p677_p2, %p673_p12 }
  0x38   : > { %681 = shalt.err (!%p678_p4)
}
  0x39   : > { %555 = dma.hbm_to_vmem [thread:$0]  (!%p892_p7), %s258_s18, 128, %s260_s11, %s248_s24  }
  0x3a   : > { %268 = sbr.rel (%p841_p3) target bundleno = 476 (0x1dc), region = 44  ;;  %s927_s2 = sand.u32 (!%p841_p3), 1, %s763_s22  }
  0x3b   : > { %s930_s14 = sshll.u32 (!%p841_p3), %s927_s2, 3  ;;  %s271_s20 = scalar_lea.sflag (!%p841_p3), [#allocation3], %s927_s2 }
  0x3c   : > { %s274_s7 = scalar_lea.vmem (!%p841_p3), [#allocation2], %s930_s14 }
  0x3f   : > { %742 = dma.done.wait (%p872_p13), %s271_s20, 128  }
  0x40   : > { %744 = vsyncadd (%p872_p13), %s271_s20, 4294967168  ;;  %s280_s24 = sand.u32 1, %s836_s28   ;;  %s284_s11 = scalar_lea.vmem [#allocation5], %s930_s14 }
  0x41   : > { %s281_s29 = scalar_lea.sflag [#allocation6], %s280_s24 }
  0x42   : > { %746 = dma.done.wait (%p872_p13), %s281_s29, 128  }
  0x43   : > { %748 = vsyncadd (%p872_p13), %s281_s29, 4294967168 }
  0x44   : > { %750 = dma.done.wait (%p46_p1), [#allocation6], 512  }
  0x45   : > { %752 = vsyncadd (%p46_p1), [#allocation6], 4294966784  ;;  %v328_v0 = vld [vmem:[#allocation7 + $0x18] sm:$0xff]  ;;  %v327_v1 = vld [vmem:[#allocation7 + $0x10] sm:$0xff]  ;;  %vm335_vm0 = vcmask 261120   ;;  %v776_v11 = vmov 32.0  }
  0x46   : > { %351 = vmatpush.msra.mxu0 %v328_v0  ;;  %v326_v2 = vld [vmem:[#allocation7 + $0x8] sm:$0xff]  ;;  %v325_v3 = vld [vmem:[#allocation7] sm:$0xff]  ;;  %v329_v6 = vld [vmem:[%s284_s11] sm:$0xff]  ;;  %603 = vrcp.f32 %v776_v11  ;;  %s532_s10 = sshll.u32 %s836_s28, 3  ;;  %s323_s28 = scalar_lea.vmem [#allocation8], %s930_s14 }
  0x47   : > { %v324_v4 = vld [vmem:[%s274_s7] sm:$0xff]  ;;  %s410_s30 = scalar_lea.hbm %s1001_s6, %s532_s10  ;;  %s412_s8 = sshll.u32 %s323_s28, 4  ;;  %s413_s8 = int_to_ptr.vmem [resolvable:$true] %s412_s8 }
  0x48   : > { %352 = vmatpush.msra.mxu0 %v327_v1  ;;  %v600_v5 = vld [vmem:[%s998_s3] ss:$0 sm:$0xff]  ;;  %s414_s12 = sshll.u32 %s410_s30, 4  ;;  %s400_s23 = scalar_lea.sflag [#allocation4], %s927_s2  ;;  %s415_s12 = int_to_ptr.hbm [resolvable:$true] %s414_s12 }
  0x49   : > { %v334_v7 = vadd.f32 %v600_v5, %v329_v6  ;;  %v601_v32 = vld [vmem:[%s999_s4] ss:$0 sm:$0xff]  ;;  %s711_s20 = sshra.s32 %s415_s12, 4  ;;  %s717_s14 = scalar_lea.hbm %s1001_s6, 16  ;;  %s712_s20 = int_to_ptr.hbm [resolvable:$true] %s711_s20 }
  0x4a   : > { %353 = vmatpush.msra.mxu0 %v326_v2  ;;  %v602_v35 = vld [vmem:[%s1000_s5] ss:$0 sm:$0xff]  ;;  %s713_s7 = scalar_lea.hbm %s712_s20, 8  ;;  %p718_p7 = scmp.lt.s32.totalorder %s712_s20, %s1001_s6 }
  0x4b   : > { %p714_p1 = scmp.ne.s32.totalorder %s712_s20, %s713_s7  ;;  %p719_p9 = scmp.lt.s32.totalorder %s717_s14, %s713_s7 }
  0x4c   : > { %354 = vmatpush.msra.mxu0 %v325_v3  ;;  %v604_v12 = vpop.eup %603 }
  0x4d   : > { %530 = vmatmul.msk.f32.vlgmr.msra.gmra.mxu0 %vm335_vm0, %v324_v4  ;;  %v363_v13 = vmul.f32 32.0, %v604_v12  ;;  %vm367_vm1 = vweird.f32 %v604_v12  ;;  %p715_p3 = pnand %p714_p1, %p876_p0  ;;  %p720_p8 = por %p719_p9, %p718_p7 }
  0x4f   : > { %v364_v14 = vsub.f32 1.0, %v363_v13  ;;  %p716_p13 = pneg %p715_p3 }
  0x51   : > { %v365_v15 = vmul.f32 %v604_v12, %v364_v14  ;;  %p721_p10 = pnand %p720_p8, %p716_p13 }
  0x53   : > { %v366_v16 = vadd.f32 %v604_v12, %v365_v15 }
  0x55   : > { %v368_v17 = vsel %vm367_vm1, %v604_v12, %v366_v16 }
  0xca   : > { %v356_v8 = vpop.f32.mrf.mxu0 }
  0xcb   : > { %v357_v9 = vadd.f32 %v356_v8, %v334_v7 }
  0xcd   : > { %v359_v10 = vsel %vm335_vm0, %v357_v9, 0.0 }
  0xce   : > { %360 = vadd.xlane.f32.xlu0 %v359_v10 }
 0x141   : > { %v361_v18 = vpop.xlane.xlu0 %360 }
 0x142   : > { %v369_v19 = vmul.f32 %v368_v17, %v361_v18 }
 0x144   : > { %v370_v20 = vsub.f32 %v357_v9, %v369_v19 }
 0x146   : > { %v371_v21 = vmul.f32 %v370_v20, %v370_v20 }
 0x148   : > { %v372_v22 = vsel %vm335_vm0, %v371_v21, 0.0 }
 0x149   : > { %373 = vadd.xlane.f32.xlu0 %v372_v22 }
 0x1bc   : > { %v374_v23 = vpop.xlane.xlu0 %373 }
 0x1bd   : > { %v375_v24 = vmul.f32 %v374_v23, %v368_v17 }
 0x1bf   : > { %v376_v25 = vadd.f32 1e-12, %v375_v24 }
 0x1c1   : > { %605 = vrsqrt.f32 %v376_v25  ;;  %vm383_vm3 = vweird.f32 %v376_v25 }
 0x1c7   : > { %v606_v26 = vpop.eup %605 }
 0x1c8   : > { %v378_v27 = vmul.f32 %v606_v26, %v376_v25  ;;  %vm384_vm2 = vweird.f32 %v606_v26 }
 0x1c9   : > { %vm385_vm4 = vmor %vm383_vm3, %vm384_vm2 }
 0x1ca   : > { %v379_v28 = vmul.f32 %v606_v26, %v378_v27 }
 0x1cc   : > { %v380_v29 = vmul.f32 0.5, %v379_v28 }
 0x1ce   : > { %v381_v30 = vsub.f32 1.5, %v380_v29 }
 0x1d0   : > { %v382_v31 = vmul.f32 %v606_v26, %v381_v30 }
 0x1d2   : > { %v386_v33 = vsel %vm385_vm4, %v606_v26, %v382_v31 }
 0x1d3   : > { %v387_v34 = vmul.f32 %v386_v33, %v370_v20 }
 0x1d5   : > { %v392_v36 = vmul.f32 %v601_v32, %v387_v34 }
 0x1d7   : > { %v397_v37 = vadd.f32 %v602_v35, %v392_v36 }
 0x1d9   : > { %398 = vst.msk [vmem:[%s323_s28] sm:$0xff] %vm335_vm0, %v397_v37 }
 0x1da   : > { %724 = shalt.err (!%p721_p10)
}
 0x1db   : > { %543 = dma.vmem_to_hbm [thread:$0]  (%p876_p0), %s413_s8, 128, %s415_s12, %s400_s23  }
 0x1dc PF: > { %s1018_s2 = sld [smem:[#allocation14_spill]]  ;;  %s426_s9 = sand.u32 1, %s759_s21  }
 0x1dd   : > { %s427_s10 = scalar_lea.sflag [#allocation4], %s426_s9 }
 0x1e2   : > { %p1019_p12 = scmp.ge.s32.totalorder %s1018_s2, 2 }
 0x1e4   : > { %p557_p5 = pnand %p1019_p12, %p882_p6 }
 0x1e6   : > { %p558_p11 = pneg %p557_p5 }
 0x1e8   : > { %754 = dma.done.wait (%p558_p11), %s427_s10, 128  }
 0x1e9   : > { %756 = vsyncadd (%p558_p11), %s427_s10, 4294967168  ;;  %s1020_s24 = sld [smem:[#allocation15_spill]]  ;;  %s1023_s21 = smov %s763_s22 }
 0x1ea   : > { %s1021_s13 = sld [smem:[#allocation13_spill]] }
 0x1eb   : > { %s1022_s23 = sld [smem:[#allocation16_spill]] }
 0x1ef   : > { %p22_p2 = scmp.ge.s32.totalorder %s1020_s24, 4  }
 0x1f0   : > { %s1024_s22 = smov %s1021_s13 }
 0x1f1   :  { %24 = sbr.rel (!%p22_p2) target bundleno = 9 (0x9), region = 106 }
 0x1f6   :  { %433 = vsyncpa [#allocation3], 1 }
 0x1f7   :  { %435 = vsyncpa [#allocation3 + $0x1], 1 }
 0x1f8   :  { %436 = vsyncpa [#allocation6], 1 }
 0x1f9   :  { %438 = vsyncpa [#allocation6 + $0x1], 1 }
 0x1fa   :  { %439 = vsyncpa [#allocation4], 1 }
 0x1fb   :  { %441 = vsyncpa [#allocation4 + $0x1], 1 }

// kernel: tpu_custom_call.1
= control target key start
LH: loop header
LB: loop body
LE: loop exit
PB: predicated region body
PF: predicated region fallthrough
CT: control target
= control target key end

     0   :  { %s995_s0 = inlined_call_operand.hbm [shape: f32[16,32], index: 0, kind: input, shape index: {}]   ;;  %s996_s1 = inlined_call_operand.hbm [shape: f32[16,32], index: 1, kind: input, shape index: {}]   ;;  %s997_s2 = inlined_call_operand.hbm [shape: f32[32,32], index: 2, kind: input, shape index: {}]   ;;  %s998_s3 = inlined_call_operand.vmem [shape: f32[1,32], index: 3, kind: input, shape index: {}]   ;;  %s999_s4 = inlined_call_operand.vmem [shape: f32[1,32], index: 4, kind: input, shape index: {}]   ;;  %s1000_s5 = inlined_call_operand.vmem [shape: f32[1,32], index: 5, kind: input, shape index: {}]   ;;  %s1001_s6 = inlined_call_operand.hbm [shape: f32[16,32], index: 6, kind: output, shape index: {}]  }
   0x1   :  { %1006 = sst [smem:[#allocation17_spill]] %s997_s2 }
   0x2   :  { %11 = vsyncpa [#allocation3], 0 }
   0x3   :  { %13 = vsyncpa [#allocation3 + $0x1], 0 }
   0x4   :  { %14 = vsyncpa [#allocation6], 0 }
   0x5   :  { %16 = vsyncpa [#allocation6 + $0x1], 0 }
   0x6   :  { %17 = vsyncpa [#allocation4], 0 }
   0x7   :  { %19 = vsyncpa [#allocation4 + $0x1], 0  ;;  %s812_s21 = smov 0   ;;  %s814_s22 = smov 0  }
   0x8   :  { %s816_s23 = smov 0   ;;  %s818_s24 = smov 0  }
   0x9 LB: > { %1007 = sst [smem:[#allocation13_spill]] %s767_s23  ;;  %s836_s28 = sadd.s32 4294967295, %s771_s24   ;;  %s771_s24 = sphi %s818_s24, %s1020_s24   ;;  %s767_s23 = sphi %s816_s23, %s1022_s23   ;;  %s763_s22 = sphi %s814_s22, %s1024_s22   ;;  %s759_s21 = sphi %s812_s21, %s1023_s21  }
   0xa   : > { %1008 = sst [smem:[#allocation14_spill]] %s771_s24  ;;  %p518_p0 = scmp.ge.s32.totalorder %s771_s24, 1 }
   0xb   : > { %s1009_s2 = sld [smem:[#allocation17_spill]]  ;;  %p46_p1 = scmp.eq.s32.totalorder %s836_s28, 0 }
   0xc   : > { %p192_p2 = scmp.lt.s32.totalorder %s771_s24, 3  ;;  %s773_s30 = smov [#allocation7]  }
   0xd   : > { %s205_s7 = sshll.u32 %s773_s30, 4  ;;  %s774_s8 = smov 128   ;;  %s206_s7 = int_to_ptr.vmem [resolvable:$true] %s205_s7 }
   0xe   : > { %p841_p3 = pnand %p518_p0, %p192_p2  ;;  %s775_s9 = smov 8  }
   0xf   : > { %s517_s10 = sadd.s32 4294967294, %s771_s24   ;;  %s852_s11 = sadd.s32 1, %s771_s24  }
  0x10   : > { %p545_p4 = pneg %p841_p3  ;;  %1011 = sst [smem:[#allocation15_spill]] %s852_s11 }
  0x11   : > { %s203_s27 = sshll.u32 %s1009_s2, 4  ;;  %s32_s12 = sadd.s32 1, %s767_s23  ;;  %s204_s27 = int_to_ptr.hbm [resolvable:$true] %s203_s27 }
  0x12   : > { %p546_p6 = pnand %p545_p4, %p46_p1  ;;  %s29_s13 = ssub.s32 %s771_s24, %s852_s11 }
  0x13   : > { %p39_p7 = scmp.ne.s32.totalorder %s767_s23, %s763_s22  ;;  %p30_p8 = scmp.eq.s32.totalorder %s29_s13, 0 }
  0x14   : > { %548 = dma.hbm_to_vmem [thread:$0]  (!%p546_p6), %s204_s27, 512, %s206_s7, [#allocation6], %s774_s8, %s774_s8, %s775_s9  }
  0x15   : > { %p40_p9 = scmp.eq.s32.totalorder %s771_s24, 0  ;;  %p45_p10 = scmp.ne.s32.totalorder %s763_s22, %s759_s21 }
  0x16   : > { %p179_p11 = scmp.eq.s32.totalorder %s836_s28, 1  ;;  %p185_p2 = scmp.eq.s32.totalorder %s517_s10, 1 }
  0x17   : > { %s864_s14 = scalar_select %p30_p8, %s767_s23, %s32_s12  }
  0x18   : > { %p866_p12 = por %p40_p9, %p39_p7  ;;  %p872_p13 = por %p46_p1, %p45_p10 }
  0x19   : > { %1012 = sst [smem:[#allocation16_spill]] %s864_s14  ;;  %p876_p0 = por %p179_p11, %p39_p7 }
  0x1a   : > { %p561_p4 = scmp.lt.s32.totalorder %s771_s24, 2  ;;  %s228_s18 = sand.u32 1, %s767_s23  }
  0x1b   : > { %p882_p6 = por %p185_p2, %p45_p10  ;;  %s521_s20 = sshll.u32 %s228_s18, 3 }
  0x1c   : > { %s522_s25 = sshll.u32 %s771_s24, 3  ;;  %s232_s8 = scalar_lea.vmem [#allocation2], %s521_s20 }
  0x1d   : > { %s236_s30 = scalar_lea.hbm %s995_s0, %s522_s25  ;;  %s240_s9 = sshll.u32 %s232_s8, 4  ;;  %s241_s9 = int_to_ptr.vmem [resolvable:$true] %s240_s9 }
  0x1e   : > { %s238_s7 = sshll.u32 %s236_s30, 4  ;;  %p892_p7 = pnand %p561_p4, %p866_p12  ;;  %s239_s7 = int_to_ptr.hbm [resolvable:$true] %s238_s7 }
  0x1f   : > { %s255_s2 = scalar_lea.hbm %s996_s1, %s522_s25  ;;  %s247_s14 = sand.u32 1, %s771_s24  }
  0x20   : > { %s229_s23 = scalar_lea.sflag [#allocation3], %s228_s18  ;;  %s637_s26 = sshra.s32 %s239_s7, 4  ;;  %s638_s26 = int_to_ptr.hbm [resolvable:$true] %s637_s26 }
  0x21   : > { %s639_s27 = scalar_lea.hbm %s638_s26, 8  ;;  %p641_p9 = pneg %p892_p7 }
  0x22   : > { %p640_p8 = scmp.ne.s32.totalorder %s638_s26, %s639_s27  ;;  %s644_s8 = scalar_lea.hbm %s995_s0, 16 }
  0x23   : > { %p645_p12 = scmp.lt.s32.totalorder %s638_s26, %s995_s0  ;;  %p646_p2 = scmp.lt.s32.totalorder %s644_s8, %s639_s27 }
  0x24   : > { %p642_p10 = pnand %p641_p9, %p640_p8 }
  0x25   : > { %p647_p4 = por %p646_p2, %p645_p12 }
  0x26   : > { %p643_p11 = pneg %p642_p10 }
  0x28   : > { %p648_p5 = pnand %p647_p4, %p643_p11 }
  0x2a   : > { %651 = shalt.err (!%p648_p5)
}
  0x2b   : > { %552 = dma.hbm_to_vmem [thread:$0]  (!%p892_p7), %s239_s7, 128, %s241_s9, %s229_s23  }
  0x2c   : > { %s257_s18 = sshll.u32 %s255_s2, 4  ;;  %s251_s25 = scalar_lea.vmem [#allocation5], %s521_s20  ;;  %s258_s18 = int_to_ptr.hbm [resolvable:$true] %s257_s18 }
  0x2d   : > { %s259_s11 = sshll.u32 %s251_s25, 4  ;;  %s248_s24 = scalar_lea.sflag [#allocation6], %s247_s14  ;;  %s260_s11 = int_to_ptr.vmem [resolvable:$true] %s259_s11 }
  0x2e   : > { %s667_s15 = sshra.s32 %s258_s18, 4  ;;  %s674_s8 = scalar_lea.hbm %s996_s1, 16  ;;  %s668_s15 = int_to_ptr.hbm [resolvable:$true] %s667_s15 }
  0x2f   : > { %s669_s30 = scalar_lea.hbm %s668_s15, 8  ;;  %p675_p5 = scmp.lt.s32.totalorder %s668_s15, %s996_s1 }
  0x30   : > { %p670_p8 = scmp.ne.s32.totalorder %s668_s15, %s669_s30  ;;  %p676_p11 = scmp.lt.s32.totalorder %s674_s8, %s669_s30 }
  0x32   : > { %p672_p10 = pnand %p670_p8, %p641_p9  ;;  %p677_p2 = por %p676_p11, %p675_p5 }
  0x34   : > { %p673_p12 = pneg %p672_p10 }
  0x36   : > { %p678_p4 = pnand %p677_p2, %p673_p12 }
  0x38   : > { %681 = shalt.err (!%p678_p4)
}
  0x39   : > { %555 = dma.hbm_to_vmem [thread:$0]  (!%p892_p7), %s258_s18, 128, %s260_s11, %s248_s24  }
  0x3a   : > { %268 = sbr.rel (%p841_p3) target bundleno = 476 (0x1dc), region = 44  ;;  %s927_s2 = sand.u32 (!%p841_p3), 1, %s763_s22  }
  0x3b   : > { %s930_s14 = sshll.u32 (!%p841_p3), %s927_s2, 3  ;;  %s271_s20 = scalar_lea.sflag (!%p841_p3), [#allocation3], %s927_s2 }
  0x3c   : > { %s274_s7 = scalar_lea.vmem (!%p841_p3), [#allocation2], %s930_s14 }
  0x3f   : > { %742 = dma.done.wait (%p872_p13), %s271_s20, 128  }
  0x40   : > { %744 = vsyncadd (%p872_p13), %s271_s20, 4294967168  ;;  %s280_s24 = sand.u32 1, %s836_s28   ;;  %s284_s11 = scalar_lea.vmem [#allocation5], %s930_s14 }
  0x41   : > { %s281_s29 = scalar_lea.sflag [#allocation6], %s280_s24 }
  0x42   : > { %746 = dma.done.wait (%p872_p13), %s281_s29, 128  }
  0x43   : > { %748 = vsyncadd (%p872_p13), %s281_s29, 4294967168 }
  0x44   : > { %750 = dma.done.wait (%p46_p1), [#allocation6], 512  }
  0x45   : > { %752 = vsyncadd (%p46_p1), [#allocation6], 4294966784  ;;  %v328_v0 = vld [vmem:[#allocation7 + $0x18] sm:$0xff]  ;;  %v327_v1 = vld [vmem:[#allocation7 + $0x10] sm:$0xff]  ;;  %vm335_vm0 = vcmask 261120   ;;  %v776_v11 = vmov 32.0  }
  0x46   : > { %351 = vmatpush.msra.mxu0 %v328_v0  ;;  %v326_v2 = vld [vmem:[#allocation7 + $0x8] sm:$0xff]  ;;  %v325_v3 = vld [vmem:[#allocation7] sm:$0xff]  ;;  %v329_v6 = vld [vmem:[%s284_s11] sm:$0xff]  ;;  %603 = vrcp.f32 %v776_v11  ;;  %s532_s10 = sshll.u32 %s836_s28, 3  ;;  %s323_s28 = scalar_lea.vmem [#allocation8], %s930_s14 }
  0x47   : > { %v324_v4 = vld [vmem:[%s274_s7] sm:$0xff]  ;;  %s410_s30 = scalar_lea.hbm %s1001_s6, %s532_s10  ;;  %s412_s8 = sshll.u32 %s323_s28, 4  ;;  %s413_s8 = int_to_ptr.vmem [resolvable:$true] %s412_s8 }
  0x48   : > { %352 = vmatpush.msra.mxu0 %v327_v1  ;;  %v600_v5 = vld [vmem:[%s998_s3] ss:$0 sm:$0xff]  ;;  %s414_s12 = sshll.u32 %s410_s30, 4  ;;  %s400_s23 = scalar_lea.sflag [#allocation4], %s927_s2  ;;  %s415_s12 = int_to_ptr.hbm [resolvable:$true] %s414_s12 }
  0x49   : > { %v334_v7 = vadd.f32 %v600_v5, %v329_v6  ;;  %v601_v32 = vld [vmem:[%s999_s4] ss:$0 sm:$0xff]  ;;  %s711_s20 = sshra.s32 %s415_s12, 4  ;;  %s717_s14 = scalar_lea.hbm %s1001_s6, 16  ;;  %s712_s20 = int_to_ptr.hbm [resolvable:$true] %s711_s20 }
  0x4a   : > { %353 = vmatpush.msra.mxu0 %v326_v2  ;;  %v602_v35 = vld [vmem:[%s1000_s5] ss:$0 sm:$0xff]  ;;  %s713_s7 = scalar_lea.hbm %s712_s20, 8  ;;  %p718_p7 = scmp.lt.s32.totalorder %s712_s20, %s1001_s6 }
  0x4b   : > { %p714_p1 = scmp.ne.s32.totalorder %s712_s20, %s713_s7  ;;  %p719_p9 = scmp.lt.s32.totalorder %s717_s14, %s713_s7 }
  0x4c   : > { %354 = vmatpush.msra.mxu0 %v325_v3  ;;  %v604_v12 = vpop.eup %603 }
  0x4d   : > { %530 = vmatmul.msk.f32.vlgmr.msra.gmra.mxu0 %vm335_vm0, %v324_v4  ;;  %v363_v13 = vmul.f32 32.0, %v604_v12  ;;  %vm367_vm1 = vweird.f32 %v604_v12  ;;  %p715_p3 = pnand %p714_p1, %p876_p0  ;;  %p720_p8 = por %p719_p9, %p718_p7 }
  0x4f   : > { %v364_v14 = vsub.f32 1.0, %v363_v13  ;;  %p716_p13 = pneg %p715_p3 }
  0x51   : > { %v365_v15 = vmul.f32 %v604_v12, %v364_v14  ;;  %p721_p10 = pnand %p720_p8, %p716_p13 }
  0x53   : > { %v366_v16 = vadd.f32 %v604_v12, %v365_v15 }
  0x55   : > { %v368_v17 = vsel %vm367_vm1, %v604_v12, %v366_v16 }
  0xca   : > { %v356_v8 = vpop.f32.mrf.mxu0 }
  0xcb   : > { %v357_v9 = vadd.f32 %v356_v8, %v334_v7 }
  0xcd   : > { %v359_v10 = vsel %vm335_vm0, %v357_v9, 0.0 }
  0xce   : > { %360 = vadd.xlane.f32.xlu0 %v359_v10 }
 0x141   : > { %v361_v18 = vpop.xlane.xlu0 %360 }
 0x142   : > { %v369_v19 = vmul.f32 %v368_v17, %v361_v18 }
 0x144   : > { %v370_v20 = vsub.f32 %v357_v9, %v369_v19 }
 0x146   : > { %v371_v21 = vmul.f32 %v370_v20, %v370_v20 }
 0x148   : > { %v372_v22 = vsel %vm335_vm0, %v371_v21, 0.0 }
 0x149   : > { %373 = vadd.xlane.f32.xlu0 %v372_v22 }
 0x1bc   : > { %v374_v23 = vpop.xlane.xlu0 %373 }
 0x1bd   : > { %v375_v24 = vmul.f32 %v374_v23, %v368_v17 }
 0x1bf   : > { %v376_v25 = vadd.f32 1e-12, %v375_v24 }
 0x1c1   : > { %605 = vrsqrt.f32 %v376_v25  ;;  %vm383_vm3 = vweird.f32 %v376_v25 }
 0x1c7   : > { %v606_v26 = vpop.eup %605 }
 0x1c8   : > { %v378_v27 = vmul.f32 %v606_v26, %v376_v25  ;;  %vm384_vm2 = vweird.f32 %v606_v26 }
 0x1c9   : > { %vm385_vm4 = vmor %vm383_vm3, %vm384_vm2 }
 0x1ca   : > { %v379_v28 = vmul.f32 %v606_v26, %v378_v27 }
 0x1cc   : > { %v380_v29 = vmul.f32 0.5, %v379_v28 }
 0x1ce   : > { %v381_v30 = vsub.f32 1.5, %v380_v29 }
 0x1d0   : > { %v382_v31 = vmul.f32 %v606_v26, %v381_v30 }
 0x1d2   : > { %v386_v33 = vsel %vm385_vm4, %v606_v26, %v382_v31 }
 0x1d3   : > { %v387_v34 = vmul.f32 %v386_v33, %v370_v20 }
 0x1d5   : > { %v392_v36 = vmul.f32 %v601_v32, %v387_v34 }
 0x1d7   : > { %v397_v37 = vadd.f32 %v602_v35, %v392_v36 }
 0x1d9   : > { %398 = vst.msk [vmem:[%s323_s28] sm:$0xff] %vm335_vm0, %v397_v37 }
 0x1da   : > { %724 = shalt.err (!%p721_p10)
}
 0x1db   : > { %543 = dma.vmem_to_hbm [thread:$0]  (%p876_p0), %s413_s8, 128, %s415_s12, %s400_s23  }
 0x1dc PF: > { %s1018_s2 = sld [smem:[#allocation14_spill]]  ;;  %s426_s9 = sand.u32 1, %s759_s21  }
 0x1dd   : > { %s427_s10 = scalar_lea.sflag [#allocation4], %s426_s9 }
 0x1e2   : > { %p1019_p12 = scmp.ge.s32.totalorder %s1018_s2, 2 }
 0x1e4   : > { %p557_p5 = pnand %p1019_p12, %p882_p6 }
 0x1e6   : > { %p558_p11 = pneg %p557_p5 }
 0x1e8   : > { %754 = dma.done.wait (%p558_p11), %s427_s10, 128  }
 0x1e9   : > { %756 = vsyncadd (%p558_p11), %s427_s10, 4294967168  ;;  %s1020_s24 = sld [smem:[#allocation15_spill]]  ;;  %s1023_s21 = smov %s763_s22 }
 0x1ea   : > { %s1021_s13 = sld [smem:[#allocation13_spill]] }
 0x1eb   : > { %s1022_s23 = sld [smem:[#allocation16_spill]] }
 0x1ef   : > { %p22_p2 = scmp.ge.s32.totalorder %s1020_s24, 4  }
 0x1f0   : > { %s1024_s22 = smov %s1021_s13 }
 0x1f1   :  { %24 = sbr.rel (!%p22_p2) target bundleno = 9 (0x9), region = 106 }
 0x1f6   :  { %433 = vsyncpa [#allocation3], 1 }
 0x1f7   :  { %435 = vsyncpa [#allocation3 + $0x1], 1 }
 0x1f8   :  { %436 = vsyncpa [#allocation6], 1 }
 0x1f9   :  { %438 = vsyncpa [#allocation6 + $0x1], 1 }
 0x1fa   :  { %439 = vsyncpa [#allocation4], 1 }
 0x1fb   :  { %441 = vsyncpa [#allocation4 + $0x1], 1 }

</bundles_post_ra>
